<compile_context>
chip_gen: v5e
topology: v5e:2x2
jax: 0.10.0
libtpu: 0.0.40
codegen_flags: <defaults>
</compile_context>

<pallas_src>
import jax
import jax.numpy as jnp
from jax.experimental import pallas as pl
from jax.experimental.pallas import tpu as pltpu

NUM_CLASSES = 71      # len(hiragana_alphabet)
HIDDEN = 64
DEFAULT_TILE_B = 4096  # max rows per grid step (fits VMEM on v5e/v6e/v7x)


def _round_up(n: int, m: int) -> int:
    return ((n + m - 1) // m) * m


def _mlp_kernel(x_ref, w1_ref, b1_ref, w2_ref, b2_ref, w3_ref, b3_ref, o_ref):
    # x_ref: (TILE_B, 71) f32 ; weights bf16 ; biases f32 ; output (TILE_B, 71) f32.
    x = x_ref[...].astype(jnp.bfloat16)

    # fc1 + ReLU  (bf16 MXU inputs, f32 accumulate; Mosaic pads K=71 internally)
    h1 = jnp.dot(x, w1_ref[...], preferred_element_type=jnp.float32) + b1_ref[...]
    h1 = jnp.maximum(h1, 0.0).astype(jnp.bfloat16)

    # fc2 + ReLU
    h2 = jnp.dot(h1, w2_ref[...], preferred_element_type=jnp.float32) + b2_ref[...]
    h2 = jnp.maximum(h2, 0.0).astype(jnp.bfloat16)

    # fc3 (logits, no activation)
    out = jnp.dot(h2, w3_ref[...], preferred_element_type=jnp.float32) + b3_ref[...]
    o_ref[...] = out.astype(o_ref.dtype)


def _prepare_params(params):
    """Cast weights to bf16 (matmul inputs); keep biases f32. Tiny, one-time."""
    return dict(
        w1=params["w1"].astype(jnp.bfloat16),   # (71, 64)
        b1=params["b1"],                        # (1, 64) f32
        w2=params["w2"].astype(jnp.bfloat16),   # (64, 64)
        b2=params["b2"],                        # (1, 64) f32
        w3=params["w3"].astype(jnp.bfloat16),   # (64, 71)
        b3=params["b3"],                        # (1, 71) f32
    )


def _choose_tile(batch: int, tile_b_max: int):
    """Pick a batch tile that minimizes padding and keeps >=2 steps when useful."""
    n_steps = max(1, pl.cdiv(batch, tile_b_max))
    # Enough work -> at least 2 grid steps so v7x megacore uses both TCs.
    if batch >= 1024:
        n_steps = max(n_steps, 2)
    tile_b = _round_up(pl.cdiv(batch, n_steps), 8)
    n_steps = max(1, pl.cdiv(batch, tile_b))
    return tile_b, n_steps


def hiragana_forward(x, params, tile_b_max: int = DEFAULT_TILE_B):
    """x: (B, 71) float32.  params: dict of w1,b1,w2,b2,w3,b3 (PyTorch-equivalent)."""
    B = x.shape[0]
    pp = _prepare_params(params)
    tile_b, n_steps = _choose_tile(B, tile_b_max)

    resident = lambda a: pl.BlockSpec(a.shape, lambda i: (0, 0))

    out = pl.pallas_call(
        _mlp_kernel,
        out_shape=jax.ShapeDtypeStruct((B, NUM_CLASSES), jnp.float32),
        grid=(n_steps,),
        in_specs=[
            pl.BlockSpec((tile_b, NUM_CLASSES), lambda i: (i, 0)),  # x tile
            resident(pp["w1"]), resident(pp["b1"]),                 # fc1
            resident(pp["w2"]), resident(pp["b2"]),                 # fc2
            resident(pp["w3"]), resident(pp["b3"]),                 # fc3
        ],
        out_specs=pl.BlockSpec((tile_b, NUM_CLASSES), lambda i: (i, 0)),
        compiler_params=pltpu.CompilerParams(
            dimension_semantics=("parallel",),
            vmem_limit_bytes=32 * 1024 * 1024,  # footprint <16 MiB; headroom on v7x
        ),
    )(x, pp["w1"], pp["b1"], pp["w2"], pp["b2"], pp["w3"], pp["b3"])

    return out


def init_params(key):
    """Deterministic init mimicking nn.Linear's uniform(-1/sqrt(fan_in), ...)."""
    def linear(k, fan_in, fan_out):
        kw, kb = jax.random.split(k)
        bound = 1.0 / jnp.sqrt(fan_in)
        w = jax.random.uniform(kw, (fan_in, fan_out), jnp.float32, -bound, bound)
        b = jax.random.uniform(kb, (1, fan_out), jnp.float32, -bound, bound)
        return w, b

    k1, k2, k3 = jax.random.split(key, 3)
    w1, b1 = linear(k1, NUM_CLASSES, HIDDEN)
    w2, b2 = linear(k2, HIDDEN, HIDDEN)
    w3, b3 = linear(k3, HIDDEN, NUM_CLASSES)
    return {"w1": w1, "b1": b1, "w2": w2, "b2": b2, "w3": w3, "b3": b3}


def _reference_f32(x, p):
    h1 = jnp.maximum(x @ p["w1"] + p["b1"], 0.0)
    h2 = jnp.maximum(h1 @ p["w2"] + p["b2"], 0.0)
    return h2 @ p["w3"] + p["b3"]


def _reference_bf16(x, p):
    """Reference mirroring the kernel's bf16-matmul / f32-accumulate arithmetic."""
    xb = x.astype(jnp.bfloat16)
    w1 = p["w1"].astype(jnp.bfloat16)
    w2 = p["w2"].astype(jnp.bfloat16)
    w3 = p["w3"].astype(jnp.bfloat16)
    h1 = jnp.maximum(
        jnp.dot(xb, w1, preferred_element_type=jnp.float32) + p["b1"], 0.0
    ).astype(jnp.bfloat16)
    h2 = jnp.maximum(
        jnp.dot(h1, w2, preferred_element_type=jnp.float32) + p["b2"], 0.0
    ).astype(jnp.bfloat16)
    return jnp.dot(h2, w3, preferred_element_type=jnp.float32) + p["b3"]


if __name__ == "__main__":
    key = jax.random.PRNGKey(0)
    k_params, k_x = jax.random.split(key)

    params = init_params(k_params)
    batch = 8
    x = jax.random.normal(k_x, (batch, NUM_CLASSES), jnp.float32)

    out = hiragana_forward(x, params)
    out = jax.block_until_ready(out)
    assert out.shape == (batch, NUM_CLASSES)
    assert out.dtype == jnp.float32

    # Tight check against a reference that follows the same bf16-input /
    # f32-accumulate arithmetic as the kernel.
    ref_bf16 = _reference_bf16(x, params)
    assert jnp.allclose(out, ref_bf16, atol=1e-3, rtol=1e-3)

    # Loose sanity check against the pure-f32 PyTorch-equivalent forward
    # (bf16 matmul inputs lose mantissa, so tolerances are relaxed).
    ref_f32 = _reference_f32(x, params)
    assert jnp.allclose(out, ref_f32, atol=5e-2, rtol=5e-2)

    print("KERNEL_OK")
</pallas_src>

<mosaic_0001>
module attributes {stable_mosaic.version = 11 : i64} {
  func.func @_mlp_kernel(%arg0: i32, %arg1: memref<8x71xf32, #tpu.memory_space<vmem>>, %arg2: memref<71x64xbf16, #tpu.memory_space<vmem>>, %arg3: memref<1x64xf32, #tpu.memory_space<vmem>>, %arg4: memref<64x64xbf16, #tpu.memory_space<vmem>>, %arg5: memref<1x64xf32, #tpu.memory_space<vmem>>, %arg6: memref<64x71xbf16, #tpu.memory_space<vmem>>, %arg7: memref<1x71xf32, #tpu.memory_space<vmem>>, %arg8: memref<8x71xf32, #tpu.memory_space<vmem>>) attributes {dimension_semantics = [#tpu.dimension_semantics<parallel>], iteration_bounds = array<i64: 1>, scalar_prefetch = 0 : i64, scratch_operands = 0 : i64, tpu.core_type = #tpu.core_type<tc>, window_params = [{transform_indices = @transform_0, window_bounds = array<i64: 8, 71>}, {pipeline_mode = #tpu.pipeline_mode<synchronous>, transform_indices = @transform_1, window_bounds = array<i64: 71, 64>}, {pipeline_mode = #tpu.pipeline_mode<synchronous>, transform_indices = @transform_2, window_bounds = array<i64: 1, 64>}, {pipeline_mode = #tpu.pipeline_mode<synchronous>, transform_indices = @transform_3, window_bounds = array<i64: 64, 64>}, {pipeline_mode = #tpu.pipeline_mode<synchronous>, transform_indices = @transform_4, window_bounds = array<i64: 1, 64>}, {pipeline_mode = #tpu.pipeline_mode<synchronous>, transform_indices = @transform_5, window_bounds = array<i64: 64, 71>}, {pipeline_mode = #tpu.pipeline_mode<synchronous>, transform_indices = @transform_6, window_bounds = array<i64: 1, 71>}, {transform_indices = @transform_7, window_bounds = array<i64: 8, 71>}]} {
    %c0 = arith.constant 0 : index
    %c0_0 = arith.constant 0 : index
    %0 = vector.load %arg1[%c0, %c0_0] : memref<8x71xf32, #tpu.memory_space<vmem>>, vector<8x71xf32>
    %1 = arith.truncf %0 : vector<8x71xf32> to vector<8x71xbf16>
    %c0_1 = arith.constant 0 : index
    %c0_2 = arith.constant 0 : index
    %2 = vector.load %arg2[%c0_1, %c0_2] : memref<71x64xbf16, #tpu.memory_space<vmem>>, vector<71x64xbf16>
    %cst = arith.constant dense<0.000000e+00> : vector<8x64xf32>
    %3 = tpu.matmul %1, %2, %cst {dimension_numbers = #tpu.dot_dimension_numbers<[1], [0], [0], [1], [0, 0, 1, 1], [], []>} : vector<8x71xbf16>, vector<71x64xbf16>, vector<8x64xf32> -> vector<8x64xf32>
    %c0_3 = arith.constant 0 : index
    %c0_4 = arith.constant 0 : index
    %4 = vector.load %arg3[%c0_3, %c0_4] : memref<1x64xf32, #tpu.memory_space<vmem>>, vector<1x64xf32>
    %5 = vector.broadcast %4 : vector<1x64xf32> to vector<8x64xf32>
    %6 = arith.addf %3, %5 : vector<8x64xf32>
    %cst_5 = arith.constant 0.000000e+00 : f32
    %7 = vector.broadcast %cst_5 : f32 to vector<8x64xf32>
    %8 = arith.maximumf %6, %7 : vector<8x64xf32>
    %9 = arith.truncf %8 : vector<8x64xf32> to vector<8x64xbf16>
    %c0_6 = arith.constant 0 : index
    %c0_7 = arith.constant 0 : index
    %10 = vector.load %arg4[%c0_6, %c0_7] : memref<64x64xbf16, #tpu.memory_space<vmem>>, vector<64x64xbf16>
    %cst_8 = arith.constant dense<0.000000e+00> : vector<8x64xf32>
    %11 = tpu.matmul %9, %10, %cst_8 {dimension_numbers = #tpu.dot_dimension_numbers<[1], [0], [0], [1], [0, 0, 1, 1], [], []>} : vector<8x64xbf16>, vector<64x64xbf16>, vector<8x64xf32> -> vector<8x64xf32>
    %c0_9 = arith.constant 0 : index
    %c0_10 = arith.constant 0 : index
    %12 = vector.load %arg5[%c0_9, %c0_10] : memref<1x64xf32, #tpu.memory_space<vmem>>, vector<1x64xf32>
    %13 = vector.broadcast %12 : vector<1x64xf32> to vector<8x64xf32>
    %14 = arith.addf %11, %13 : vector<8x64xf32>
    %cst_11 = arith.constant 0.000000e+00 : f32
    %15 = vector.broadcast %cst_11 : f32 to vector<8x64xf32>
    %16 = arith.maximumf %14, %15 : vector<8x64xf32>
    %17 = arith.truncf %16 : vector<8x64xf32> to vector<8x64xbf16>
    %c0_12 = arith.constant 0 : index
    %c0_13 = arith.constant 0 : index
    %18 = vector.load %arg6[%c0_12, %c0_13] : memref<64x71xbf16, #tpu.memory_space<vmem>>, vector<64x71xbf16>
    %cst_14 = arith.constant dense<0.000000e+00> : vector<8x71xf32>
    %19 = tpu.matmul %17, %18, %cst_14 {dimension_numbers = #tpu.dot_dimension_numbers<[1], [0], [0], [1], [0, 0, 1, 1], [], []>} : vector<8x64xbf16>, vector<64x71xbf16>, vector<8x71xf32> -> vector<8x71xf32>
    %c0_15 = arith.constant 0 : index
    %c0_16 = arith.constant 0 : index
    %20 = vector.load %arg7[%c0_15, %c0_16] : memref<1x71xf32, #tpu.memory_space<vmem>>, vector<1x71xf32>
    %21 = vector.broadcast %20 : vector<1x71xf32> to vector<8x71xf32>
    %22 = arith.addf %19, %21 : vector<8x71xf32>
    %c0_17 = arith.constant 0 : index
    %c0_18 = arith.constant 0 : index
    %23 = vector.load %arg8[%c0_17, %c0_18] : memref<8x71xf32, #tpu.memory_space<vmem>>, vector<8x71xf32>
    tpu.vector_store %arg8[%c0_17, %c0_18], %22 {strides = array<i32>} : memref<8x71xf32, #tpu.memory_space<vmem>>, vector<8x71xf32>,
    return
  }
  func.func @transform_0(%arg0: i32) -> (i32, i32) {
    %c0_i32 = arith.constant 0 : i32
    %c0_i32_0 = arith.constant 0 : i32
    return %arg0, %c0_i32 : i32, i32
  }
  func.func @transform_1(%arg0: i32) -> (i32, i32) {
    %c0_i32 = arith.constant 0 : i32
    %c0_i32_0 = arith.constant 0 : i32
    %c0_i32_1 = arith.constant 0 : i32
    return %c0_i32, %c0_i32_0 : i32, i32
  }
  func.func @transform_2(%arg0: i32) -> (i32, i32) {
    %c0_i32 = arith.constant 0 : i32
    %c0_i32_0 = arith.constant 0 : i32
    %c0_i32_1 = arith.constant 0 : i32
    return %c0_i32, %c0_i32_0 : i32, i32
  }
  func.func @transform_3(%arg0: i32) -> (i32, i32) {
    %c0_i32 = arith.constant 0 : i32
    %c0_i32_0 = arith.constant 0 : i32
    %c0_i32_1 = arith.constant 0 : i32
    return %c0_i32, %c0_i32_0 : i32, i32
  }
  func.func @transform_4(%arg0: i32) -> (i32, i32) {
    %c0_i32 = arith.constant 0 : i32
    %c0_i32_0 = arith.constant 0 : i32
    %c0_i32_1 = arith.constant 0 : i32
    return %c0_i32, %c0_i32_0 : i32, i32
  }
  func.func @transform_5(%arg0: i32) -> (i32, i32) {
    %c0_i32 = arith.constant 0 : i32
    %c0_i32_0 = arith.constant 0 : i32
    %c0_i32_1 = arith.constant 0 : i32
    return %c0_i32, %c0_i32_0 : i32, i32
  }
  func.func @transform_6(%arg0: i32) -> (i32, i32) {
    %c0_i32 = arith.constant 0 : i32
    %c0_i32_0 = arith.constant 0 : i32
    %c0_i32_1 = arith.constant 0 : i32
    return %c0_i32, %c0_i32_0 : i32, i32
  }
  func.func @transform_7(%arg0: i32) -> (i32, i32) {
    %c0_i32 = arith.constant 0 : i32
    %c0_i32_0 = arith.constant 0 : i32
    return %arg0, %c0_i32 : i32, i32
  }
}

</mosaic_0001>

<bundles_post_ra>
// kernel: tpu_custom_call.1
= control target key start
LH: loop header
LB: loop body
LE: loop exit
PB: predicated region body
PF: predicated region fallthrough
CT: control target
= control target key end

     0   :  { %12 = vsyncpa [#allocation3], 0  ;;  %s455_s0 = inlined_call_operand.hbm [shape: f32[8,71], index: 0, kind: input, shape index: {}]   ;;  %s456_s1 = inlined_call_operand.vmem [shape: bf16[71,64], index: 1, kind: input, shape index: {}]   ;;  %s457_s2 = inlined_call_operand.vmem [shape: f32[1,64], index: 2, kind: input, shape index: {}]   ;;  %s458_s3 = inlined_call_operand.vmem [shape: bf16[64,64], index: 3, kind: input, shape index: {}]   ;;  %s459_s4 = inlined_call_operand.vmem [shape: f32[1,64], index: 4, kind: input, shape index: {}]   ;;  %s460_s5 = inlined_call_operand.vmem [shape: bf16[64,71], index: 5, kind: input, shape index: {}]   ;;  %s461_s6 = inlined_call_operand.vmem [shape: f32[1,71], index: 6, kind: input, shape index: {}]   ;;  %s462_s7 = inlined_call_operand.hbm [shape: f32[8,71], index: 7, kind: output, shape index: {}]  }
   0x1   :  { %13 = vsyncpa [#allocation4], 0  ;;  %s19_s26 = sshll.u32 %s455_s0, 4  ;;  %s356_s27 = smov [#allocation2]   ;;  %s20_s26 = int_to_ptr.hbm [resolvable:$true] %s19_s26 }
   0x2   :  { %s21_s28 = sshll.u32 %s356_s27, 4  ;;  %s22_s28 = int_to_ptr.vmem [resolvable:$true] %s21_s28 }
   0x3   :  { %24 = dma.hbm_to_vmem [thread:$0]  %s20_s26, 128, %s22_s28, [#allocation3]  }
   0x4   :  { %352 = dma.done.wait [#allocation3], 128  }
   0x5   :  { %353 = vsyncadd [#allocation3], 4294967168  ;;  %vm88_vm0 = vcmask 1042432   ;;  %vm89_vm1 = vcmask 1043456   ;;  %v357_v0 = vmov 65535   ;;  %v293_v5 = vld [vmem:[%s458_s3 + $0x18] sm:$0xff] }
   0x6   :  { %v90_v1 = vsel %vm88_vm0, 4294967295, %v357_v0  ;;  %v52_v2 = vld [vmem:[%s456_s1 + $0x20] sm:$0xf]  ;;  %154 = vmatpush.bf16.msra.mxu1 %v293_v5  ;;  %v292_v7 = vld [vmem:[%s458_s3 + $0x10] sm:$0xff]  ;;  %v289_v9 = vld [vmem:[%s456_s1 + $0x18] sm:$0xff]  ;;  %vm84_vm2 = vcmask 580608  }
   0x7   :  { %v74_v3 = vunpack.c.l.b16 %v52_v2  ;;  %v91_v4 = vsel %vm89_vm1, %v90_v1, 0  ;;  %v288_v10 = vld [vmem:[%s456_s1 + $0x10] sm:$0xff]  ;;  %v287_v11 = vld [vmem:[%s456_s1 + $0x8] sm:$0xff]  ;;  %v286_v12 = vld [vmem:[%s456_s1] sm:$0xff]  ;;  %vm146_vm3 = vcmask 523264   ;;  %s358_s10 = smov [#allocation5]  }
   0x8   :  { %v42_v13 = vld [vmem:[#allocation2] sm:$0xff]  ;;  %v291_v15 = vld [vmem:[%s458_s3 + $0x8] sm:$0xff]  ;;  %v297_v17 = vld [vmem:[%s460_s5 + $0x18] sm:$0xff]  ;;  %s223_s11 = sshll.u32 %s358_s10, 4  ;;  %s224_s11 = int_to_ptr.vmem [resolvable:$true] %s223_s11 }
   0x9   :  { %v79_v6 = vpack.c.b16 %v74_v3, %v74_v3  ;;  %v43_v14 = vpack.c.bf16 %v42_v13, %v42_v13  ;;  %v290_v16 = vld [vmem:[%s458_s3] sm:$0xff]  ;;  %208 = vmatpush.bf16.msra.mxu2 %v297_v17  ;;  %v296_v18 = vld [vmem:[%s460_s5 + $0x10] sm:$0xff]  ;;  %v295_v25 = vld [vmem:[%s460_s5 + $0x8] sm:$0xff] }
   0xa   :  { %155 = vmatpush.bf16.msra.mxu1 %v292_v7  ;;  %v301_v19 = vld [vmem:[%s457_s2] ss:$0 sm:$0xff] }
   0xb   :  { %v93_v8 = vand.u32 %v91_v4, %v79_v6  ;;  %v294_v26 = vld [vmem:[%s460_s5] sm:$0xff]  ;;  %s225_s5 = sshll.u32 %s462_s7, 4  ;;  %s226_s5 = int_to_ptr.hbm [resolvable:$true] %s225_s5 }
   0xc   :  { %v302_v27 = vld [vmem:[%s459_s4] ss:$0 sm:$0xff] }
   0xd   :  { %98 = vmatpush.bf16.msra.mxu0 %v93_v8  ;;  %209 = vmatpush.bf16.msra.mxu2 %v296_v18  ;;  %v303_v33 = vld [vmem:[%s461_s6] ss:$0 sm:$0xff] }
   0xe   :  { %156 = vmatpush.bf16.msra.mxu1 %v291_v15 }
  0x11   :  { %99 = vmatpush.bf16.msra.mxu0 %v289_v9  ;;  %210 = vmatpush.bf16.msra.mxu2 %v295_v25 }
  0x12   :  { %157 = vmatpush.bf16.msra.mxu1 %v290_v16 }
  0x15   :  { %100 = vmatpush.bf16.msra.mxu0 %v288_v10  ;;  %211 = vmatpush.bf16.msra.mxu2 %v294_v26 }
  0x19   :  { %101 = vmatpush.bf16.msra.mxu0 %v287_v11 }
  0x1d   :  { %102 = vmatpush.bf16.msra.mxu0 %v286_v12 }
  0x20   :  { %251 = vmatmul.msk.bf16.vlgmr.msra.gmra.mxu0 %vm84_vm2, %v43_v14 }
  0x9d   :  { %v104_v20 = vpop.f32.mrf.mxu0 }
  0x9e   :  { %v105_v21 = vadd.f32 %v301_v19, %v104_v20 }
  0xa0   :  { %v108_v22 = vmax.f32 %v105_v21, 0.0 }
  0xa2   :  { %v109_v23 = vpack.c.bf16 %v108_v22, %v108_v22 }
  0xa4   :  { %268 = vmatmul.msk.bf16.vlgmr.msra.gmra.mxu1 %vm146_vm3, %v109_v23 }
  0xa5   :  { %v106_v24 = vpop.f32.mrf.mxu0 }
 0x121   :  { %v159_v28 = vpop.f32.mrf.mxu1 }
 0x122   :  { %v160_v29 = vadd.f32 %v302_v27, %v159_v28 }
 0x124   :  { %v163_v30 = vmax.f32 %v160_v29, 0.0 }
 0x126   :  { %v164_v31 = vpack.c.bf16 %v163_v30, %v163_v30 }
 0x128   :  { %285 = vmatmul.msk.bf16.vlgmr.msra.gmra.mxu2 %vm146_vm3, %v164_v31 }
 0x129   :  { %v161_v32 = vpop.f32.mrf.mxu1 }
 0x1ab   :  { %v213_v34 = vpop.f32.mrf.mxu2 }
 0x1ac   :  { %v214_v35 = vadd.f32 %v303_v33, %v213_v34 }
 0x1ae   :  { %217 = vst.msk [vmem:[#allocation5] sm:$0xff] %vm84_vm2, %v214_v35 }
 0x1af   :  { %228 = dma.vmem_to_hbm [thread:$0]  %s224_s11, 128, %s226_s5, [#allocation4]  }
 0x1b3   :  { %v215_v36 = vpop.f32.mrf.mxu2 }
 0x1b4   :  { %354 = dma.done.wait [#allocation4], 128  }
 0x1b5   :  { %355 = vsyncadd [#allocation4], 4294967168 }
 0x1b6   :  { %233 = vsyncpa [#allocation3], 1 }
 0x1b7   :  { %234 = vsyncpa [#allocation4], 1 }

</bundles_post_ra>
